<compile_context>
chip_gen: v6e
topology: v6e:2x2x1
jax: 0.10.0
libtpu: 0.0.40
codegen_flags: <defaults>
</compile_context>

<pallas_src>
import jax
import jax.numpy as jnp
from jax.experimental import pallas as pl
from jax.experimental.pallas import tpu as pltpu

BN_EPS = 1e-5
HEAD_ORDER = ("influence", "class_type", "cxy_offset", "heading", "z_coor", "dim")
HEAD_CHANNELS = (1, 3, 2, 1, 1, 3)
CMID = 64
HEAD_PAD = 128          # lane-dense fused-head output width (11 real channels)
MAX_ROW_TILE = 1024     # rows per grid step; fits comfortably in VMEM on v5e/v6e/v7x


def _round_up(x, m):
    return (x + m - 1) // m * m


# --------------------- kernel 1: conv matmul + BN partial stats ---------------------
def _conv_stats_kernel(p_ref, w_ref, conv_ref, stats_ref):
    # (TM, K) @ (K, 64) bf16 operands on the MXU, f32 accumulate.
    acc = jnp.dot(p_ref[0], w_ref[...], preferred_element_type=jnp.float32)
    conv_ref[0] = acc
    # Single-pass per-channel partial sums for train-mode BatchNorm (f32).
    s = jnp.sum(acc, axis=0, keepdims=True)            # (1, 64)
    sq = jnp.sum(acc * acc, axis=0, keepdims=True)     # (1, 64)
    stats_ref[0] = jnp.concatenate([s, sq], axis=0)    # (2, 64)


# --------------- kernel 2: BN apply + 2x2 max-pool + fused 1x1 heads ----------------
def _bn_pool_heads_kernel(conv_ref, scale_ref, shift_ref, w_ref, b_ref, o_ref):
    x = conv_ref[...]                                  # (4, TM, 64) f32
    bn = x * scale_ref[...] + shift_ref[...]           # BN affine in f32 (VPU)
    pooled = jnp.maximum(jnp.maximum(bn[0], bn[1]),
                         jnp.maximum(bn[2], bn[3]))    # 2x2 max-pool, (TM, 64)
    o_ref[...] = jnp.dot(pooled.astype(jnp.bfloat16), w_ref[...],
                         preferred_element_type=jnp.float32) + b_ref[...]


def init_params(key):
    ks = jax.random.split(key, 2 + 2 * len(HEAD_ORDER))
    params = {
        "w_conv": 0.05 * jax.random.normal(ks[0], (CMID, 3, 7, 7), jnp.float32),
        # b_conv kept for API parity; it is exactly cancelled by train-mode BN.
        "b_conv": 0.05 * jax.random.normal(ks[1], (CMID,), jnp.float32),
        "bn_gamma": jnp.ones((CMID,), jnp.float32),    # PyTorch BN default init
        "bn_beta": jnp.zeros((CMID,), jnp.float32),
    }
    for i, (name, c) in enumerate(zip(HEAD_ORDER, HEAD_CHANNELS)):
        params[f"w_{name}"] = 0.05 * jax.random.normal(
            ks[2 + 2 * i], (c, CMID, 1, 1), jnp.float32)
        params[f"b_{name}"] = 0.05 * jax.random.normal(
            ks[3 + 2 * i], (c,), jnp.float32)
    return params


def zolo_forward(x_nchw, params):
    N, Cin, H, W = x_nchw.shape
    KH = KW = 7
    stride, pad = 2, 3
    Ho = (H + 2 * pad - KH) // stride + 1
    Wo = (W + 2 * pad - KW) // stride + 1
    # TODO(synk): odd Ho/Wo (MaxPool2d floor behaviour) is not handled by the
    # 4-tap pooled layout; the reference-sized inputs give even conv outputs.
    assert Ho % 2 == 0 and Wo % 2 == 0, "conv output must be even for 2x2 pool"
    Hp, Wp = Ho // 2, Wo // 2
    Mp = N * Hp * Wp                  # pooled rows
    M_total = N * Ho * Wo             # conv rows (BN statistic count)
    K = Cin * KH * KW

    # ---- glue: NCHW -> NHWC (bf16), pad, im2col grouped by 2x2 pool tap ------
    # NOTE: in-kernel im2col (halo DMA) would cut this HBM expansion further;
    # kept as XLA glue here for simplicity.
    x = jnp.transpose(x_nchw, (0, 2, 3, 1)).astype(jnp.bfloat16)
    x_pad = jnp.pad(x, ((0, 0), (pad, pad), (pad, pad), (0, 0)))
    tap_slabs = []
    for dh in (0, 1):
        for dw in (0, 1):
            taps = []
            for kh in range(KH):
                for kw in range(KW):
                    r0 = kh + stride * dh
                    c0 = kw + stride * dw
                    taps.append(
                        x_pad[:, r0:r0 + 2 * stride * (Hp - 1) + 1:2 * stride,
                              c0:c0 + 2 * stride * (Wp - 1) + 1:2 * stride, :])
            # K index = cin*49 + kh*7 + kw, matching w_conv.reshape(64, K).
            tap_slabs.append(jnp.stack(taps, axis=-1).reshape(Mp, K))
    patches = jnp.stack(tap_slabs, axis=0)              # (4, Mp, K) bf16

    # Pad rows so each tap slab is a whole number of tiles.  Zero rows add
    # exactly zero to the BN partial sums (no conv bias applied in-kernel).
    TM = min(MAX_ROW_TILE, _round_up(Mp, 8))
    Mp_pad = _round_up(Mp, TM)
    nmt = Mp_pad // TM
    if Mp_pad != Mp:
        patches = jnp.pad(patches, ((0, 0), (0, Mp_pad - Mp), (0, 0)))

    w_conv = jnp.transpose(params["w_conv"].reshape(CMID, K)).astype(jnp.bfloat16)

    # ---- kernel 1: tiled conv matmul + per-tile BN partial stats --------------
    flops1 = 2 * 4 * Mp_pad * K * CMID
    bytes1 = (patches.size * 2 + w_conv.size * 2
              + 4 * Mp_pad * CMID * 4 + 4 * nmt * 2 * CMID * 4)
    conv_out, stats = pl.pallas_call(
        _conv_stats_kernel,
        out_shape=(jax.ShapeDtypeStruct((4, Mp_pad, CMID), jnp.float32),
                   jax.ShapeDtypeStruct((4 * nmt, 2, CMID), jnp.float32)),
        grid=(4, nmt),
        in_specs=[
            pl.BlockSpec((1, TM, K), lambda t, i: (t, i, 0)),
            pl.BlockSpec((K, CMID), lambda t, i: (0, 0)),
        ],
        out_specs=(
            pl.BlockSpec((1, TM, CMID), lambda t, i: (t, i, 0)),
            pl.BlockSpec((1, 2, CMID), lambda t, i: (t * nmt + i, 0, 0)),
        ),
        compiler_params=pltpu.CompilerParams(
            dimension_semantics=("parallel", "parallel"),
            vmem_limit_bytes=32 * 1024 * 1024),
        cost_estimate=pl.CostEstimate(flops=flops1, transcendentals=0,
                                      bytes_accessed=bytes1),
    )(patches, w_conv)

    # ---- glue: reduce partial stats, fold gamma/beta into (scale, shift) -----
    tot = jnp.sum(stats, axis=0)                               # (2, 64)
    mean = tot[0] / M_total
    # Biased variance (PyTorch train mode); clamp guards f32 cancellation.
    var = jnp.maximum(tot[1] / M_total - mean * mean, 0.0)
    scale = params["bn_gamma"] * jax.lax.rsqrt(var + BN_EPS)
    shift = params["bn_beta"] - mean * scale
    scale = scale.reshape(1, CMID).astype(jnp.float32)
    shift = shift.reshape(1, CMID).astype(jnp.float32)

    # All six 1x1-conv heads fused into one (64 -> 128) weight, zero-padded for
    # a lane-dense output; the 11 real channels are sliced out afterwards.
    head_w = jnp.concatenate(
        [params[f"w_{h}"].reshape(-1, CMID) for h in HEAD_ORDER], axis=0)  # (11,64)
    head_b = jnp.concatenate([params[f"b_{h}"] for h in HEAD_ORDER], axis=0)
    Cout = head_w.shape[0]
    head_w_pad = jnp.zeros((CMID, HEAD_PAD), jnp.bfloat16).at[:, :Cout].set(
        jnp.transpose(head_w).astype(jnp.bfloat16))
    head_b_pad = jnp.zeros((1, HEAD_PAD), jnp.float32).at[0, :Cout].set(head_b)

    # ---- kernel 2: BN apply + max-pool + fused heads --------------------------
    flops2 = 2 * Mp_pad * CMID * HEAD_PAD + 11 * Mp_pad * CMID
    bytes2 = (conv_out.size * 4 + Mp_pad * HEAD_PAD * 4
              + head_w_pad.size * 2 + (2 * CMID + HEAD_PAD) * 4)
    out = pl.pallas_call(
        _bn_pool_heads_kernel,
        out_shape=jax.ShapeDtypeStruct((Mp_pad, HEAD_PAD), jnp.float32),
        grid=(nmt,),
        in_specs=[
            pl.BlockSpec((4, TM, CMID), lambda i: (0, i, 0)),
            pl.BlockSpec((1, CMID), lambda i: (0, 0)),
            pl.BlockSpec((1, CMID), lambda i: (0, 0)),
            pl.BlockSpec((CMID, HEAD_PAD), lambda i: (0, 0)),
            pl.BlockSpec((1, HEAD_PAD), lambda i: (0, 0)),
        ],
        out_specs=pl.BlockSpec((TM, HEAD_PAD), lambda i: (i, 0)),
        compiler_params=pltpu.CompilerParams(
            dimension_semantics=("parallel",),
            vmem_limit_bytes=32 * 1024 * 1024),
        cost_estimate=pl.CostEstimate(flops=flops2, transcendentals=0,
                                      bytes_accessed=bytes2),
    )(conv_out, scale, shift, head_w_pad, head_b_pad)

    # ---- glue: split channels, return NCHW dict like the PyTorch module ------
    out = out[:Mp, :Cout].reshape(N, Hp, Wp, Cout)
    results = {}
    off = 0
    for name, c in zip(HEAD_ORDER, HEAD_CHANNELS):
        results[name] = jnp.transpose(out[..., off:off + c], (0, 3, 1, 2))
        off += c
    return results


if __name__ == "__main__":
    key = jax.random.PRNGKey(0)
    pkey, xkey = jax.random.split(key)
    params = init_params(pkey)
    x = jax.random.normal(xkey, (2, 3, 16, 16), jnp.float32)  # NCHW

    outs = jax.jit(zolo_forward)(x, params)
    outs = jax.block_until_ready(outs)

    expected = {
        "influence": (2, 1, 4, 4),
        "class_type": (2, 3, 4, 4),
        "cxy_offset": (2, 2, 4, 4),
        "heading": (2, 1, 4, 4),
        "z_coor": (2, 1, 4, 4),
        "dim": (2, 3, 4, 4),
    }
    for name, shape in expected.items():
        assert outs[name].shape == shape, (name, outs[name].shape)
        assert bool(jnp.all(jnp.isfinite(outs[name])))
    print("KERNEL_OK")
</pallas_src>

<mosaic_0001>
module attributes {stable_mosaic.version = 11 : i64} {
  func.func @_conv_stats_kernel(%arg0: i32, %arg1: i32, %arg2: memref<1x32x147xbf16, #tpu.memory_space<vmem>>, %arg3: memref<147x64xbf16, #tpu.memory_space<vmem>>, %arg4: memref<1x32x64xf32, #tpu.memory_space<vmem>>, %arg5: memref<1x2x64xf32, #tpu.memory_space<vmem>>) attributes {dimension_semantics = [#tpu.dimension_semantics<parallel>, #tpu.dimension_semantics<parallel>], iteration_bounds = array<i64: 4, 1>, scalar_prefetch = 0 : i64, scratch_operands = 0 : i64, tpu.core_type = #tpu.core_type<tc>, window_params = [{transform_indices = @transform_0, window_bounds = array<i64: 1, 32, 147>}, {pipeline_mode = #tpu.pipeline_mode<synchronous>, transform_indices = @transform_1, window_bounds = array<i64: 147, 64>}, {transform_indices = @transform_2, window_bounds = array<i64: 1, 32, 64>}, {transform_indices = @transform_3, window_bounds = array<i64: 1, 2, 64>}]} {
    %c0 = arith.constant 0 : index
    %c0_0 = arith.constant 0 : index
    %c0_1 = arith.constant 0 : index
    %0 = vector.load %arg2[%c0, %c0_0, %c0_1] : memref<1x32x147xbf16, #tpu.memory_space<vmem>>, vector<1x32x147xbf16>
    %1 = vector.shape_cast %0 : vector<1x32x147xbf16> to vector<32x147xbf16>
    %c0_2 = arith.constant 0 : index
    %c0_3 = arith.constant 0 : index
    %2 = vector.load %arg3[%c0_2, %c0_3] : memref<147x64xbf16, #tpu.memory_space<vmem>>, vector<147x64xbf16>
    %cst = arith.constant dense<0.000000e+00> : vector<32x64xf32>
    %3 = tpu.matmul %1, %2, %cst {dimension_numbers = #tpu.dot_dimension_numbers<[1], [0], [0], [1], [0, 0, 1, 1], [], []>} : vector<32x147xbf16>, vector<147x64xbf16>, vector<32x64xf32> -> vector<32x64xf32>
    %c0_4 = arith.constant 0 : index
    %c0_5 = arith.constant 0 : index
    %c0_6 = arith.constant 0 : index
    %4 = vector.load %arg4[%c0_4, %c0_5, %c0_6] : memref<1x32x64xf32, #tpu.memory_space<vmem>>, vector<1x32x64xf32>
    %5 = vector.shape_cast %4 : vector<1x32x64xf32> to vector<32x64xf32>
    %6 = vector.shape_cast %3 : vector<32x64xf32> to vector<1x32x64xf32>
    tpu.vector_store %arg4[%c0_4, %c0_5, %c0_6], %6 {strides = array<i32>} : memref<1x32x64xf32, #tpu.memory_space<vmem>>, vector<1x32x64xf32>,
    %cst_7 = arith.constant dense<0.000000e+00> : vector<64xf32>
    %7 = vector.multi_reduction <add>, %3, %cst_7 [0] : vector<32x64xf32> to vector<64xf32>
    %8 = vector.shape_cast %7 : vector<64xf32> to vector<1x64xf32>
    %9 = arith.mulf %3, %3 : vector<32x64xf32>
    %cst_8 = arith.constant dense<0.000000e+00> : vector<64xf32>
    %10 = vector.multi_reduction <add>, %9, %cst_8 [0] : vector<32x64xf32> to vector<64xf32>
    %11 = vector.shape_cast %10 : vector<64xf32> to vector<1x64xf32>
    %12 = tpu.concatenate %8, %11 in 0 : vector<1x64xf32>, vector<1x64xf32> -> vector<2x64xf32>
    %c0_9 = arith.constant 0 : index
    %c0_10 = arith.constant 0 : index
    %c0_11 = arith.constant 0 : index
    %13 = vector.load %arg5[%c0_9, %c0_10, %c0_11] : memref<1x2x64xf32, #tpu.memory_space<vmem>>, vector<1x2x64xf32>
    %14 = vector.shape_cast %13 : vector<1x2x64xf32> to vector<2x64xf32>
    %15 = vector.shape_cast %12 : vector<2x64xf32> to vector<1x2x64xf32>
    tpu.vector_store %arg5[%c0_9, %c0_10, %c0_11], %15 {strides = array<i32>} : memref<1x2x64xf32, #tpu.memory_space<vmem>>, vector<1x2x64xf32>,
    return
  }
  func.func @transform_0(%arg0: i32, %arg1: i32) -> (i32, i32, i32) {
    %c0_i32 = arith.constant 0 : i32
    %c0_i32_0 = arith.constant 0 : i32
    return %arg0, %arg1, %c0_i32 : i32, i32, i32
  }
  func.func @transform_1(%arg0: i32, %arg1: i32) -> (i32, i32) {
    %c0_i32 = arith.constant 0 : i32
    %c0_i32_0 = arith.constant 0 : i32
    %c0_i32_1 = arith.constant 0 : i32
    return %c0_i32, %c0_i32_0 : i32, i32
  }
  func.func @transform_2(%arg0: i32, %arg1: i32) -> (i32, i32, i32) {
    %c0_i32 = arith.constant 0 : i32
    %c0_i32_0 = arith.constant 0 : i32
    return %arg0, %arg1, %c0_i32 : i32, i32, i32
  }
  func.func @transform_3(%arg0: i32, %arg1: i32) -> (i32, i32, i32) {
    %c1_i32 = arith.constant 1 : i32
    %0 = arith.muli %arg0, %c1_i32 : i32
    %1 = arith.addi %0, %arg1 : i32
    %c0_i32 = arith.constant 0 : i32
    %c0_i32_0 = arith.constant 0 : i32
    %c0_i32_1 = arith.constant 0 : i32
    return %1, %c0_i32, %c0_i32_0 : i32, i32, i32
  }
}

module attributes {stable_mosaic.version = 11 : i64} {
  func.func @_bn_pool_heads_kernel(%arg0: i32, %arg1: memref<4x32x64xf32, #tpu.memory_space<vmem>>, %arg2: memref<1x64xf32, #tpu.memory_space<vmem>>, %arg3: memref<1x64xf32, #tpu.memory_space<vmem>>, %arg4: memref<64x128xbf16, #tpu.memory_space<vmem>>, %arg5: memref<1x128xf32, #tpu.memory_space<vmem>>, %arg6: memref<32x128xf32, #tpu.memory_space<vmem>>) attributes {dimension_semantics = [#tpu.dimension_semantics<parallel>], iteration_bounds = array<i64: 1>, scalar_prefetch = 0 : i64, scratch_operands = 0 : i64, tpu.core_type = #tpu.core_type<tc>, window_params = [{transform_indices = @transform_0, window_bounds = array<i64: 4, 32, 64>}, {pipeline_mode = #tpu.pipeline_mode<synchronous>, transform_indices = @transform_1, window_bounds = array<i64: 1, 64>}, {pipeline_mode = #tpu.pipeline_mode<synchronous>, transform_indices = @transform_2, window_bounds = array<i64: 1, 64>}, {pipeline_mode = #tpu.pipeline_mode<synchronous>, transform_indices = @transform_3, window_bounds = array<i64: 64, 128>}, {pipeline_mode = #tpu.pipeline_mode<synchronous>, transform_indices = @transform_4, window_bounds = array<i64: 1, 128>}, {transform_indices = @transform_5, window_bounds = array<i64: 32, 128>}]} {
    %c0 = arith.constant 0 : index
    %c0_0 = arith.constant 0 : index
    %c0_1 = arith.constant 0 : index
    %0 = vector.load %arg1[%c0, %c0_0, %c0_1] : memref<4x32x64xf32, #tpu.memory_space<vmem>>, vector<4x32x64xf32>
    %c0_2 = arith.constant 0 : index
    %c0_3 = arith.constant 0 : index
    %1 = vector.load %arg2[%c0_2, %c0_3] : memref<1x64xf32, #tpu.memory_space<vmem>>, vector<1x64xf32>
    %2 = vector.shape_cast %1 : vector<1x64xf32> to vector<1x1x64xf32>
    %3 = vector.broadcast %2 : vector<1x1x64xf32> to vector<4x32x64xf32>
    %4 = arith.mulf %0, %3 : vector<4x32x64xf32>
    %c0_4 = arith.constant 0 : index
    %c0_5 = arith.constant 0 : index
    %5 = vector.load %arg3[%c0_4, %c0_5] : memref<1x64xf32, #tpu.memory_space<vmem>>, vector<1x64xf32>
    %6 = vector.shape_cast %5 : vector<1x64xf32> to vector<1x1x64xf32>
    %7 = vector.broadcast %6 : vector<1x1x64xf32> to vector<4x32x64xf32>
    %8 = arith.addf %4, %7 : vector<4x32x64xf32>
    %9 = vector.extract_strided_slice %8 {offsets = [0, 0, 0], sizes = [1, 32, 64], strides = [1, 1, 1]} : vector<4x32x64xf32> to vector<1x32x64xf32>
    %10 = vector.shape_cast %9 : vector<1x32x64xf32> to vector<32x64xf32>
    %11 = vector.extract_strided_slice %8 {offsets = [1, 0, 0], sizes = [1, 32, 64], strides = [1, 1, 1]} : vector<4x32x64xf32> to vector<1x32x64xf32>
    %12 = vector.shape_cast %11 : vector<1x32x64xf32> to vector<32x64xf32>
    %13 = arith.maximumf %10, %12 : vector<32x64xf32>
    %14 = vector.extract_strided_slice %8 {offsets = [2, 0, 0], sizes = [1, 32, 64], strides = [1, 1, 1]} : vector<4x32x64xf32> to vector<1x32x64xf32>
    %15 = vector.shape_cast %14 : vector<1x32x64xf32> to vector<32x64xf32>
    %16 = vector.extract_strided_slice %8 {offsets = [3, 0, 0], sizes = [1, 32, 64], strides = [1, 1, 1]} : vector<4x32x64xf32> to vector<1x32x64xf32>
    %17 = vector.shape_cast %16 : vector<1x32x64xf32> to vector<32x64xf32>
    %18 = arith.maximumf %15, %17 : vector<32x64xf32>
    %19 = arith.maximumf %13, %18 : vector<32x64xf32>
    %20 = arith.truncf %19 : vector<32x64xf32> to vector<32x64xbf16>
    %c0_6 = arith.constant 0 : index
    %c0_7 = arith.constant 0 : index
    %21 = vector.load %arg4[%c0_6, %c0_7] : memref<64x128xbf16, #tpu.memory_space<vmem>>, vector<64x128xbf16>
    %cst = arith.constant dense<0.000000e+00> : vector<32x128xf32>
    %22 = tpu.matmul %20, %21, %cst {dimension_numbers = #tpu.dot_dimension_numbers<[1], [0], [0], [1], [0, 0, 1, 1], [], []>} : vector<32x64xbf16>, vector<64x128xbf16>, vector<32x128xf32> -> vector<32x128xf32>
    %c0_8 = arith.constant 0 : index
    %c0_9 = arith.constant 0 : index
    %23 = vector.load %arg5[%c0_8, %c0_9] : memref<1x128xf32, #tpu.memory_space<vmem>>, vector<1x128xf32>
    %24 = vector.broadcast %23 : vector<1x128xf32> to vector<32x128xf32>
    %25 = arith.addf %22, %24 : vector<32x128xf32>
    %c0_10 = arith.constant 0 : index
    %c0_11 = arith.constant 0 : index
    %26 = vector.load %arg6[%c0_10, %c0_11] : memref<32x128xf32, #tpu.memory_space<vmem>>, vector<32x128xf32>
    tpu.vector_store %arg6[%c0_10, %c0_11], %25 {strides = array<i32>} : memref<32x128xf32, #tpu.memory_space<vmem>>, vector<32x128xf32>,
    return
  }
  func.func @transform_0(%arg0: i32) -> (i32, i32, i32) {
    %c0_i32 = arith.constant 0 : i32
    %c0_i32_0 = arith.constant 0 : i32
    %c0_i32_1 = arith.constant 0 : i32
    return %c0_i32, %arg0, %c0_i32_0 : i32, i32, i32
  }
  func.func @transform_1(%arg0: i32) -> (i32, i32) {
    %c0_i32 = arith.constant 0 : i32
    %c0_i32_0 = arith.constant 0 : i32
    %c0_i32_1 = arith.constant 0 : i32
    return %c0_i32, %c0_i32_0 : i32, i32
  }
  func.func @transform_2(%arg0: i32) -> (i32, i32) {
    %c0_i32 = arith.constant 0 : i32
    %c0_i32_0 = arith.constant 0 : i32
    %c0_i32_1 = arith.constant 0 : i32
    return %c0_i32, %c0_i32_0 : i32, i32
  }
  func.func @transform_3(%arg0: i32) -> (i32, i32) {
    %c0_i32 = arith.constant 0 : i32
    %c0_i32_0 = arith.constant 0 : i32
    %c0_i32_1 = arith.constant 0 : i32
    return %c0_i32, %c0_i32_0 : i32, i32
  }
  func.func @transform_4(%arg0: i32) -> (i32, i32) {
    %c0_i32 = arith.constant 0 : i32
    %c0_i32_0 = arith.constant 0 : i32
    %c0_i32_1 = arith.constant 0 : i32
    return %c0_i32, %c0_i32_0 : i32, i32
  }
  func.func @transform_5(%arg0: i32) -> (i32, i32) {
    %c0_i32 = arith.constant 0 : i32
    %c0_i32_0 = arith.constant 0 : i32
    return %arg0, %c0_i32 : i32, i32
  }
}

</mosaic_0001>

<bundles_post_ra>
// kernel: zolo_forward.3
= control target key start
LH: loop header
LB: loop body
LE: loop exit
PB: predicated region body
PF: predicated region fallthrough
CT: control target
= control target key end

     0   :  { %vm136_vm0 = vcmask 523264   ;;  %s344_s3 = inlined_call_operand.vmem [shape: bf16[64,128], index: 3, kind: input, shape index: {}]   ;;  %s345_s0 = inlined_call_operand.vmem [shape: f32[4,32,64], index: 0, kind: input, shape index: {}]   ;;  %s346_s1 = inlined_call_operand.vmem [shape: f32[1,64], index: 1, kind: input, shape index: {}]   ;;  %s347_s2 = inlined_call_operand.vmem [shape: f32[1,64], index: 2, kind: input, shape index: {}]   ;;  %s348_s4 = inlined_call_operand.vmem [shape: f32[1,128], index: 4, kind: input, shape index: {}]   ;;  %s349_s5 = inlined_call_operand.vmem [shape: f32[32,128], index: 5, kind: output, shape index: {}]  }
   0x1   :  { %v227_v0 = vld [vmem:[%s344_s3 + $0x18] sm:$0xff]   ;;  %v228_v1 = vld [vmem:[%s344_s3 + $0x10] sm:$0xff]   ;;  %v229_v2 = vld [vmem:[%s344_s3 + $0x8] sm:$0xff]  }
   0x2   :  { %215 = vmatprep.subr.bf16.mxu0 %v227_v0  ;;  %v21_v3 = vld [vmem:[%s345_s0] sm:$0xff]  ;;  %v22_v4 = vld [vmem:[%s345_s0 + $0x8] sm:$0xff]  ;;  %v23_v22 = vld [vmem:[%s345_s0 + $0x10] sm:$0xff] }
   0x3   :  { %216 = vmatpush3.bf16.msra.mxu0 %v227_v0  ;;  %v25_v5 = vld [vmem:[%s345_s0 + $0x20] sm:$0xff]  ;;  %v26_v6 = vld [vmem:[%s345_s0 + $0x28] sm:$0xff]  ;;  %v24_v23 = vld [vmem:[%s345_s0 + $0x18] sm:$0xff] }
   0x4   :  { %217 = vmatprep.subr.bf16.mxu0 %v228_v1  ;;  %v29_v7 = vld [vmem:[%s345_s0 + $0x40] sm:$0xff]  ;;  %v30_v8 = vld [vmem:[%s345_s0 + $0x48] sm:$0xff]  ;;  %v27_v28 = vld [vmem:[%s345_s0 + $0x30] sm:$0xff] }
   0x5   :  { %v33_v9 = vld [vmem:[%s345_s0 + $0x60] sm:$0xff]  ;;  %v34_v10 = vld [vmem:[%s345_s0 + $0x68] sm:$0xff]  ;;  %v28_v29 = vld [vmem:[%s345_s0 + $0x38] sm:$0xff] }
   0x6   :  { %v200_v11 = vld [vmem:[%s346_s1] ss:$0 sm:$0xff]  ;;  %v31_v30 = vld [vmem:[%s345_s0 + $0x50] sm:$0xff]  ;;  %v32_v35 = vld [vmem:[%s345_s0 + $0x58] sm:$0xff] }
   0x7   :  { %218 = vmatpush3.bf16.msra.mxu0 %v228_v1  ;;  %v44_v12 = vmul.f32 %v200_v11, %v21_v3  ;;  %v45_v13 = vmul.f32 %v200_v11, %v22_v4  ;;  %v48_v14 = vmul.f32 %v200_v11, %v25_v5  ;;  %v49_v15 = vmul.f32 %v200_v11, %v26_v6  ;;  %v201_v16 = vld [vmem:[%s347_s2] ss:$0 sm:$0xff]  ;;  %v35_v36 = vld [vmem:[%s345_s0 + $0x70] sm:$0xff]  ;;  %v36_v37 = vld [vmem:[%s345_s0 + $0x78] sm:$0xff] }
   0x8   :  { %219 = vmatprep.subr.bf16.mxu0 %v229_v2  ;;  %v230_v17 = vld [vmem:[%s344_s3] sm:$0xff]   ;;  %v52_v18 = vmul.f32 %v200_v11, %v29_v7  ;;  %v53_v19 = vmul.f32 %v200_v11, %v30_v8  ;;  %v56_v20 = vmul.f32 %v200_v11, %v33_v9  ;;  %v57_v21 = vmul.f32 %v200_v11, %v34_v10 }
   0x9   :  { %v67_v24 = vadd.f32 %v201_v16, %v44_v12  ;;  %v68_v25 = vadd.f32 %v201_v16, %v45_v13  ;;  %v71_v26 = vadd.f32 %v201_v16, %v48_v14  ;;  %v72_v27 = vadd.f32 %v201_v16, %v49_v15  ;;  %v202_v4 = vld [vmem:[%s348_s4] ss:$0 sm:$0xff] }
   0xa   :  { %v75_v31 = vadd.f32 %v201_v16, %v52_v18  ;;  %v76_v32 = vadd.f32 %v201_v16, %v53_v19  ;;  %v79_v33 = vadd.f32 %v201_v16, %v56_v20  ;;  %v80_v34 = vadd.f32 %v201_v16, %v57_v21 }
   0xb   :  { %220 = vmatpush3.bf16.msra.mxu0 %v229_v2  ;;  %v83_v38 = vmax.f32 %v67_v24, %v71_v26  ;;  %v84_v39 = vmax.f32 %v68_v25, %v72_v27  ;;  %v46_v40 = vmul.f32 %v200_v11, %v23_v22  ;;  %v47_v41 = vmul.f32 %v200_v11, %v24_v23 }
   0xc   :  { %221 = vmatprep.subr.bf16.mxu0 %v230_v17  ;;  %v87_v42 = vmax.f32 %v75_v31, %v79_v33  ;;  %v88_v43 = vmax.f32 %v76_v32, %v80_v34  ;;  %v50_v44 = vmul.f32 %v200_v11, %v27_v28  ;;  %v51_v45 = vmul.f32 %v200_v11, %v28_v29 }
   0xd   :  { %v54_v46 = vmul.f32 %v200_v11, %v31_v30  ;;  %v55_v47 = vmul.f32 %v200_v11, %v32_v35  ;;  %v58_v48 = vmul.f32 %v200_v11, %v35_v36  ;;  %v59_v49 = vmul.f32 %v200_v11, %v36_v37 }
   0xe   :  { %v91_v50 = vmax.f32 %v83_v38, %v87_v42  ;;  %v92_v51 = vmax.f32 %v84_v39, %v88_v43  ;;  %v69_v52 = vadd.f32 %v201_v16, %v46_v40  ;;  %v70_v53 = vadd.f32 %v201_v16, %v47_v41 }
   0xf   :  { %222 = vmatpush3.bf16.msra.mxu0 %v230_v17  ;;  %v73_v54 = vadd.f32 %v201_v16, %v50_v44  ;;  %v74_v55 = vadd.f32 %v201_v16, %v51_v45  ;;  %v77_v56 = vadd.f32 %v201_v16, %v54_v46  ;;  %v78_v57 = vadd.f32 %v201_v16, %v55_v47 }
  0x10   :  { %v95_v58 = vpack.c.bf16 %v92_v51, %v91_v50  ;;  %v81_v59 = vadd.f32 %v201_v16, %v58_v48  ;;  %v82_v60 = vadd.f32 %v201_v16, %v59_v49 }
  0x11   :  { %v85_v61 = vmax.f32 %v69_v52, %v73_v54  ;;  %v86_v62 = vmax.f32 %v70_v53, %v74_v55 }
  0x12   :  { %223 = vmatprep.mubr.msk.bf16.mxu0 %vm136_vm0, %v95_v58  ;;  %v89_v63 = vmax.f32 %v77_v56, %v81_v59  ;;  %v90_v0 = vmax.f32 %v78_v57, %v82_v60 }
  0x14   :  { %v93_v1 = vmax.f32 %v85_v61, %v89_v63  ;;  %v94_v2 = vmax.f32 %v86_v62, %v90_v0 }
  0x16   :  { %v96_v3 = vpack.c.bf16 %v94_v2, %v93_v1 }
  0x18   :  { %224 = vmatmul.mubr.msk.bf16.vlgmr.msra.gmra.mxu0 %vm136_vm0, %v96_v3 }
  0xd8   :  { %v225_v5 = vpop.f32.mrf.mxu0 }
  0xd9   :  { %v186_v6 = vadd.f32 %v225_v5, %v202_v4 }
  0xda   :  { %v177_v7 = vpop.f32.mrf.mxu0 }
  0xdb   :  { %194 = vst [vmem:[%s349_s5 + $0x10] sm:$0xff] %v186_v6  ;;  %v178_v8 = vadd.f32 %v202_v4, %v177_v7 }
  0xdc   :  { %v226_v9 = vpop.f32.mrf.mxu0 }
  0xdd   :  { %192 = vst [vmem:[%s349_s5] sm:$0xff] %v178_v8  ;;  %v189_v10 = vadd.f32 %v226_v9, %v202_v4 }
  0xde   :  { %v180_v11 = vpop.f32.mrf.mxu0 }
  0xdf   :  { %195 = vst [vmem:[%s349_s5 + $0x18] sm:$0xff] %v189_v10  ;;  %v181_v12 = vadd.f32 %v202_v4, %v180_v11 }
  0xe1   :  { %193 = vst [vmem:[%s349_s5 + $0x8] sm:$0xff] %v181_v12 }

// kernel: zolo_forward.2
= control target key start
LH: loop header
LB: loop body
LE: loop exit
PB: predicated region body
PF: predicated region fallthrough
CT: control target
= control target key end

     0   :  { %s691_s12 = smov 0   ;;  %s693_s13 = smov 0   ;;  %s785_s0 = inlined_call_operand.vmem [shape: bf16[4,32,147], index: 0, kind: input, shape index: {}]   ;;  %s786_s1 = inlined_call_operand.vmem [shape: bf16[147,64], index: 1, kind: input, shape index: {}]   ;;  %s787_s2 = inlined_call_operand.vmem [shape: f32[4,32,64], index: 2, kind: output, shape index: {0}]   ;;  %s788_s3 = inlined_call_operand.vmem [shape: f32[4,2,64], index: 3, kind: output, shape index: {1}]  }
   0x1   :  { %s695_s14 = smov 0  }
   0x2 LB: > { %s26_s15 = sadd.s32 1, %s663_s13  ;;  %p557_p0 = scmp.ge.s32.totalorder %s667_s14, 1  ;;  %s667_s14 = sphi %s695_s14, %s14_s14   ;;  %s663_s13 = sphi %s693_s13, %s790_s13   ;;  %s659_s12 = sphi %s691_s12, %s789_s12  }
   0x3   : > { %p28_p1 = scmp.ge.s32.totalorder %s26_s15, 4  ;;  %p164_p2 = scmp.lt.s32.totalorder %s667_s14, 5 }
   0x5   : > { %s792_s15 = smov (%p28_p1, %s26_s15), 0  ;;  %p165_p3 = pnand %p557_p0, %p164_p2 }
   0x6   : > { %p203_p4 = scmp.lt.s32.totalorder (!%p165_p3), %s659_s12, 3 }
   0x7   : > { %168 = sbr.rel (%p165_p3) target bundleno = 273 (0x111), region = 28 }
   0xc   : > { %v629_v0 = vld [vmem:[%s786_s1 + $0x38] sm:$0xff]   ;;  %v669_v1 = vmov 0   ;;  %v630_v2 = vld [vmem:[%s786_s1 + $0x30] sm:$0xff]   ;;  %v631_v3 = vld [vmem:[%s786_s1 + $0x28] sm:$0xff]   ;;  %s794_s12 = smov (!%p203_p4, %s659_s12), 3  ;;  %vm328_vm0 = vcmask 154624  }
   0xd   : > { %342 = vmatprep.subr.bf16.mxu0 %v669_v1  ;;  %583 = vmatprep.subr.bf16.mxu1 %v669_v1  ;;  %v632_v4 = vld [vmem:[%s786_s1 + $0x20] sm:$0xff]   ;;  %s581_s24 = sshll.u32 %s794_s12, 5  ;;  %v633_v5 = vld [vmem:[%s786_s1 + $0x18] sm:$0xff]   ;;  %v634_v8 = vld [vmem:[%s786_s1 + $0x10] sm:$0xff]   ;;  %vm335_vm1 = vcmask 1040384   ;;  %vm336_vm2 = vcmask 1041408  }
   0xe   : > { %343 = vmatpush1.bf16.msra.mxu0 %v629_v0  ;;  %593 = vmatpush1.bf16.msra.mxu1 %v629_v0  ;;  %s729_s27 = scalar_lea.vmem %s785_s0, %s581_s24  ;;  %v635_v9 = vld [vmem:[%s786_s1 + $0x8] sm:$0xff]   ;;  %v670_v10 = vmov 65535   ;;  %v636_v12 = vld [vmem:[%s786_s1] sm:$0xff]   ;;  %s221_s19 = scalar_lea.vmem %s787_s2, %s581_s24  ;;  %vm391_vm3 = vcmask 523264   ;;  %vm427_vm4 = vcmask 517120  }
   0xf   : > { %344 = vmatprep.subr.bf16.mxu0 %v669_v1  ;;  %584 = vmatprep.subr.bf16.mxu1 %v669_v1  ;;  %v641_v6 = vld [vmem:[%s729_s27 + $0x4] ss:$8 sps:$4 sm:$0xff]   ;;  %v644_v7 = vld [vmem:[%s729_s27 + $0x14] ss:$8 sps:$4 sm:$0xff]   ;;  %v337_v11 = vsel %vm335_vm1, 4294967295, %v670_v10  ;;  %s562_s20 = sshll.u32 %s794_s12, 1 }
  0x10   : > { %577 = vmatprep.mubr.msk.bf16.mxu0 %vm328_vm0, %v641_v6  ;;  %578 = vmatprep.mubr.msk.bf16.mxu1 %vm328_vm0, %v644_v7  ;;  %v637_v13 = vld [vmem:[%s786_s1 + $0x48] ss:$0 sps:$4 sm:$0x33]   ;;  %v338_v14 = vsel %vm336_vm2, %v337_v11, 0  ;;  %v638_v16 = vld [vmem:[%s786_s1 + $0x40] sm:$0xff]   ;;  %s227_s23 = scalar_lea.vmem %s788_s3, %s562_s20 }
  0x11   : > { %v340_v15 = vand.u32 %v637_v13, %v338_v14  ;;  %v639_v17 = vld [vmem:[%s729_s27] ss:$8 sps:$4 sm:$0xff]   ;;  %v642_v18 = vld [vmem:[%s729_s27 + $0x10] ss:$8 sps:$4 sm:$0xff]  }
  0x12   : > { %345 = vmatpush1.bf16.msra.mxu0 %v630_v2  ;;  %594 = vmatpush1.bf16.msra.mxu1 %v630_v2 }
  0x13   : > { %346 = vmatprep.subr.bf16.mxu0 %v669_v1  ;;  %585 = vmatprep.subr.bf16.mxu1 %v669_v1 }
  0x16   : > { %347 = vmatpush1.bf16.msra.mxu0 %v631_v3  ;;  %595 = vmatpush1.bf16.msra.mxu1 %v631_v3 }
  0x17   : > { %348 = vmatprep.subr.bf16.mxu0 %v669_v1  ;;  %586 = vmatprep.subr.bf16.mxu1 %v669_v1 }
  0x1a   : > { %349 = vmatpush1.bf16.msra.mxu0 %v632_v4  ;;  %596 = vmatpush1.bf16.msra.mxu1 %v632_v4 }
  0x1b   : > { %350 = vmatprep.subr.bf16.mxu0 %v669_v1  ;;  %587 = vmatprep.subr.bf16.mxu1 %v669_v1 }
  0x1e   : > { %351 = vmatpush1.bf16.msra.mxu0 %v633_v5  ;;  %597 = vmatpush1.bf16.msra.mxu1 %v633_v5 }
  0x1f   : > { %352 = vmatprep.subr.bf16.mxu0 %v669_v1  ;;  %588 = vmatprep.subr.bf16.mxu1 %v669_v1 }
  0x22   : > { %353 = vmatpush1.bf16.msra.mxu0 %v634_v8  ;;  %598 = vmatpush1.bf16.msra.mxu1 %v634_v8 }
  0x23   : > { %354 = vmatprep.subr.bf16.mxu0 %v669_v1  ;;  %589 = vmatprep.subr.bf16.mxu1 %v669_v1 }
  0x26   : > { %355 = vmatpush1.bf16.msra.mxu0 %v635_v9  ;;  %599 = vmatpush1.bf16.msra.mxu1 %v635_v9 }
  0x27   : > { %356 = vmatprep.subr.bf16.mxu0 %v669_v1  ;;  %590 = vmatprep.subr.bf16.mxu1 %v669_v1 }
  0x2a   : > { %357 = vmatpush1.bf16.msra.mxu0 %v636_v12  ;;  %600 = vmatpush1.bf16.msra.mxu1 %v636_v12 }
  0x2b   : > { %370 = vmatprep.subr.bf16.mxu0 %v669_v1  ;;  %591 = vmatprep.subr.bf16.mxu1 %v669_v1 }
  0x2e   : > { %371 = vmatpush2.bf16.msra.mxu0 %v340_v15  ;;  %601 = vmatpush2.bf16.msra.mxu1 %v340_v15 }
  0x2f   : > { %372 = vmatprep.subr.bf16.mxu0 %v669_v1  ;;  %592 = vmatprep.subr.bf16.mxu1 %v669_v1 }
  0x32   : > { %373 = vmatpush2.bf16.msra.mxu0 %v638_v16  ;;  %602 = vmatpush2.bf16.msra.mxu1 %v638_v16 }
  0x35   : > { %375 = vmatmul.mubr.bf16.vlgmr.msra.gmra.mxu0 %v639_v17  ;;  %383 = vmatmul.mubr.bf16.vlgmr.msra.gmra.mxu1 %v642_v18 }
  0xf5   : > { %v376_v19 = vpop.f32.mrf.mxu0  ;;  %v384_v20 = vpop.f32.mrf.mxu1 }
  0xf6   : > { %392 = vst.msk [vmem:[%s221_s19] sm:$0xff] %vm391_vm3, %v376_v19  ;;  %394 = vst.msk [vmem:[%s221_s19 + $0x10] sm:$0xff] %vm391_vm3, %v384_v20  ;;  %v409_v23 = vmul.f32 %v376_v19, %v376_v19  ;;  %v396_v26 = vsel %vm391_vm3, %v376_v19, 0.0  ;;  %v411_v27 = vmul.f32 %v384_v20, %v384_v20  ;;  %v399_v34 = vsel %vm391_vm3, %v384_v20, 0.0 }
  0xf7   : > { %v378_v21 = vpop.f32.mrf.mxu0  ;;  %v386_v22 = vpop.f32.mrf.mxu1 }
  0xf8   : > { %v413_v33 = vsel %vm391_vm3, %v409_v23, 0.0  ;;  %v416_v39 = vsel %vm391_vm3, %v411_v27, 0.0 }
  0xf9   : > { %v379_v24 = vpop.f32.mrf.mxu0  ;;  %v387_v25 = vpop.f32.mrf.mxu1 }
  0xfa   : > { %393 = vst.msk [vmem:[%s221_s19 + $0x8] sm:$0xff] %vm391_vm3, %v379_v24  ;;  %v397_v28 = vsel %vm391_vm3, %v379_v24, 0.0  ;;  %v410_v29 = vmul.f32 %v379_v24, %v379_v24  ;;  %395 = vst.msk [vmem:[%s221_s19 + $0x18] sm:$0xff] %vm391_vm3, %v387_v25  ;;  %v412_v36 = vmul.f32 %v387_v25, %v387_v25  ;;  %v401_v40 = vsel %vm391_vm3, %v387_v25, 0.0 }
  0xfb   : > { %v398_v30 = vadd.f32 %v397_v28, %v396_v26  ;;  %v381_v31 = vpop.f32.mrf.mxu0  ;;  %v389_v32 = vpop.f32.mrf.mxu1 }
  0xfc   : > { %v414_v35 = vsel %vm391_vm3, %v410_v29, 0.0  ;;  %v418_v43 = vsel %vm391_vm3, %v412_v36, 0.0 }
  0xfd   : > { %v415_v37 = vadd.f32 %v414_v35, %v413_v33  ;;  %v400_v38 = vadd.f32 %v399_v34, %v398_v30 }
  0xff   : > { %v402_v41 = vadd.f32 %v401_v40, %v400_v38  ;;  %v417_v42 = vadd.f32 %v416_v39, %v415_v37 }
 0x101   : > { %v403_v44 = vrot.slane %v402_v41, 4  ;;  %v419_v45 = vadd.f32 %v418_v43, %v417_v42 }
 0x103   : > { %v404_v46 = vadd.f32 %v403_v44, %v402_v41  ;;  %v420_v47 = vrot.slane %v419_v45, 4 }
 0x105   : > { %v405_v48 = vrot.slane %v404_v46, 2  ;;  %v421_v49 = vadd.f32 %v420_v47, %v419_v45 }
 0x107   : > { %v406_v50 = vadd.f32 %v405_v48, %v404_v46  ;;  %v422_v51 = vrot.slane %v421_v49, 2 }
 0x109   : > { %v407_v52 = vrot.slane %v406_v50, 1  ;;  %v423_v53 = vadd.f32 %v422_v51, %v421_v49 }
 0x10b   : > { %v424_v54 = vrot.slane %v423_v53, 1  ;;  %v408_v55 = vadd.f32 %v407_v52, %v406_v50 }
 0x10d   : > { %v425_v56 = vadd.f32 %v424_v54, %v423_v53 }
 0x10f   : > { %v426_v57 = vsel %vm335_vm1, %v408_v55, %v425_v56 }
 0x110   : > { %428 = vst.msk [vmem:[%s227_s23] sm:$0x3] %vm427_vm4, %v426_v57 }
 0x111 PF: > { %s14_s14 = sadd.s32 1, %s667_s14   ;;  %s789_s12 = smov %s663_s13 }
 0x112   : > { %p11_p5 = scmp.ge.s32.totalorder %s14_s14, 6   ;;  %s790_s13 = smov %s792_s15 }
 0x114   :  { %13 = sbr.rel (!%p11_p5) target bundleno = 2 (0x2), region = 70 }

</bundles_post_ra>
